<compile_context>
chip_gen: v7x
topology: tpu7x:2x2x1
jax: 0.10.0
libtpu: 0.0.40
codegen_flags: <defaults>
</compile_context>

<pallas_src>
import functools

import jax
import jax.numpy as jnp
from jax.experimental import pallas as pl
from jax.experimental.pallas import tpu as pltpu


def _dice_sums_kernel(score_ref, label_ref, inter_ref, zsum_ref, ysum_ref,
                      *, apply_softmax, has_pad, hw):
    """Accumulates per-class sum(score*onehot), sum(score^2), sum(onehot).

    score_ref: (C, tile) native-dtype scores for one batch element / one tile.
    label_ref: (1, tile) int32 labels.
    *_ref outs: (C, 128) lane-dense f32 accumulators (resident across tiles).
    """
    t = pl.program_id(1)

    @pl.when(t == 0)
    def _():
        inter_ref[...] = jnp.zeros_like(inter_ref)
        zsum_ref[...] = jnp.zeros_like(zsum_ref)
        ysum_ref[...] = jnp.zeros_like(ysum_ref)

    C, tile = score_ref.shape
    n_chunks = tile // 128

    # Hoisted broadcasts (JAX does not CSE broadcast_in_dim inside the loop).
    class_ids = jax.lax.broadcasted_iota(jnp.int32, (C, 128), 0)
    if has_pad:
        lane = jax.lax.broadcasted_iota(jnp.int32, (1, 128), 1)

    inter_acc = jnp.zeros((C, 128), jnp.float32)
    zsum_acc = jnp.zeros((C, 128), jnp.float32)
    ysum_acc = jnp.zeros((C, 128), jnp.float32)

    for k in range(n_chunks):
        sl = pl.ds(k * 128, 128)
        s = score_ref[:, sl].astype(jnp.float32)        # (C, 128)
        lab = label_ref[:, sl]                          # (1, 128) int32

        if has_pad:
            # Out-of-bounds lanes of a boundary block hold unspecified data;
            # zero the scores (avoids NaN propagation) and gate the one-hot.
            col = t * tile + k * 128 + lane             # (1, 128)
            valid = col < hw                            # (1, 128) bool
            s = jnp.where(valid, s, 0.0)

        if apply_softmax:
            m = jnp.max(s, axis=0, keepdims=True)       # (1, 128)
            e = jnp.exp(s - m)
            denom = jnp.sum(e, axis=0, keepdims=True)   # (1, 128)
            inv = pl.reciprocal(denom, approx=True)     # EUP, one per column
            inv = inv * (2.0 - denom * inv)             # Newton step -> ~f32 exact
            s = e * inv
            if has_pad:
                s = jnp.where(valid, s, 0.0)            # keep pad cols out of zsum

        onehot = lab == class_ids                       # (C, 128) bool
        if has_pad:
            onehot = jnp.logical_and(onehot, valid)
        oh = onehot.astype(jnp.float32)

        inter_acc = inter_acc + s * oh
        zsum_acc = zsum_acc + s * s
        ysum_acc = ysum_acc + oh                        # onehot^2 == onehot

    inter_ref[...] += inter_acc
    zsum_ref[...] += zsum_acc
    ysum_ref[...] += ysum_acc


def dice_loss(inputs, target, n_classes, weight=None, softmax=False, tile=8192):
    """inputs: (N, C, H, W) float scores; target: (N, H, W) integer labels."""
    N, C, H, W = inputs.shape
    assert C == n_classes, f"predict C={C} & n_classes={n_classes} do not match"
    HW = H * W

    # Free reshapes only — keep native dtype/layout in HBM.
    score = inputs.reshape(N, C, HW)
    labels = target.reshape(N, 1, HW).astype(jnp.int32)

    # Spatial tile: multiple of 128 lanes, capped at the (rounded-up) image size.
    hw_round = ((HW + 127) // 128) * 128
    tile = max(128, (min(tile, hw_round) // 128) * 128)
    num_tiles = (HW + tile - 1) // tile
    has_pad = (num_tiles * tile) != HW

    kernel = functools.partial(_dice_sums_kernel,
                               apply_softmax=softmax, has_pad=has_pad, hw=HW)

    def _out_spec():
        return pl.BlockSpec((pl.Squeezed(), C, 128), lambda n, t: (n, 0, 0))

    inter, zsum, ysum = pl.pallas_call(
        kernel,
        out_shape=(
            jax.ShapeDtypeStruct((N, C, 128), jnp.float32),
            jax.ShapeDtypeStruct((N, C, 128), jnp.float32),
            jax.ShapeDtypeStruct((N, C, 128), jnp.float32),
        ),
        grid_spec=pltpu.PrefetchScalarGridSpec(
            num_scalar_prefetch=0,
            grid=(N, num_tiles),
            in_specs=[
                pl.BlockSpec((pl.Squeezed(), C, tile), lambda n, t: (n, 0, t)),
                pl.BlockSpec((pl.Squeezed(), 1, tile), lambda n, t: (n, 0, t)),
            ],
            out_specs=[_out_spec(), _out_spec(), _out_spec()],
        ),
        compiler_params=pltpu.CompilerParams(
            dimension_semantics=("parallel", "arbitrary")),
    )(score, labels)

    # Tiny final reductions + dice combination in plain JAX.
    inter = jnp.sum(inter, axis=(0, 2))   # (C,)
    zsum = jnp.sum(zsum, axis=(0, 2))
    ysum = jnp.sum(ysum, axis=(0, 2))

    smooth = 1e-5
    dice = 1.0 - (2.0 * inter + smooth) / (zsum + ysum + smooth)  # per-class loss

    if weight is None:
        weight = jnp.ones((n_classes,), jnp.float32)
    else:
        weight = jnp.asarray(weight, jnp.float32)

    return jnp.sum(dice * weight) / n_classes


def _dice_loss_ref(inputs, target, n_classes, weight=None, softmax=False):
    """Pure-JAX reference mirroring the PyTorch module."""
    inputs = inputs.astype(jnp.float32)
    if softmax:
        inputs = jax.nn.softmax(inputs, axis=1)
    onehot = jax.nn.one_hot(target, n_classes, axis=1, dtype=jnp.float32)
    if weight is None:
        weight = [1.0] * n_classes
    smooth = 1e-5
    loss = 0.0
    for i in range(n_classes):
        score = inputs[:, i]
        tgt = onehot[:, i]
        intersect = jnp.sum(score * tgt)
        y_sum = jnp.sum(tgt * tgt)
        z_sum = jnp.sum(score * score)
        dice = 1.0 - (2 * intersect + smooth) / (z_sum + y_sum + smooth)
        loss += dice * weight[i]
    return loss / n_classes


if __name__ == "__main__":
    key = jax.random.PRNGKey(0)
    k_in, k_tgt, k2_in, k2_tgt = jax.random.split(key, 4)

    n_classes = 4
    N, H, W = 2, 16, 16

    # Case 1: softmax path (as used in the TransUnet training loop), H*W % 128 == 0.
    inputs = jax.random.normal(k_in, (N, n_classes, H, W), dtype=jnp.float32)
    target = jax.random.randint(k_tgt, (N, H, W), 0, n_classes, dtype=jnp.int32)

    loss = jax.block_until_ready(
        dice_loss(inputs, target, n_classes, weight=None, softmax=True))
    ref = jax.block_until_ready(
        _dice_loss_ref(inputs, target, n_classes, weight=None, softmax=True))
    # rtol relaxed slightly vs pure f32 divide: softmax uses approx EUP
    # reciprocal + one Newton step (error ~eps^2, well under 1e-4).
    assert jnp.allclose(loss, ref, rtol=1e-4, atol=1e-6), (loss, ref)

    # Case 2: ragged spatial size (exercises the static padding mask) + weights,
    # no softmax.
    H2 = W2 = 12  # H*W = 144, not a multiple of 128
    inputs2 = jax.random.normal(k2_in, (N, n_classes, H2, W2), dtype=jnp.float32)
    target2 = jax.random.randint(k2_tgt, (N, H2, W2), 0, n_classes, dtype=jnp.int32)
    w = [0.5, 1.0, 1.5, 2.0]

    loss2 = jax.block_until_ready(
        dice_loss(inputs2, target2, n_classes, weight=w, softmax=False))
    ref2 = jax.block_until_ready(
        _dice_loss_ref(inputs2, target2, n_classes, weight=w, softmax=False))
    assert jnp.allclose(loss2, ref2, rtol=1e-4, atol=1e-6), (loss2, ref2)

    print("KERNEL_OK")
</pallas_src>

<mosaic_0001>
module attributes {stable_mosaic.version = 11 : i64} {
  func.func @_dice_sums_kernel(%arg0: i32, %arg1: i32, %arg2: memref<1x4x256xf32, #tpu.memory_space<vmem>>, %arg3: memref<1x1x256xi32, #tpu.memory_space<vmem>>, %arg4: memref<1x4x128xf32, #tpu.memory_space<vmem>>, %arg5: memref<1x4x128xf32, #tpu.memory_space<vmem>>, %arg6: memref<1x4x128xf32, #tpu.memory_space<vmem>>) attributes {dimension_semantics = [#tpu.dimension_semantics<parallel>, #tpu.dimension_semantics<arbitrary>], iteration_bounds = array<i64: 2, 1>, scalar_prefetch = 0 : i64, scratch_operands = 0 : i64, tpu.core_type = #tpu.core_type<tc>, window_params = [{transform_indices = @transform_0, window_bounds = array<i64: 1, 4, 256>}, {transform_indices = @transform_1, window_bounds = array<i64: 1, 1, 256>}, {transform_indices = @transform_2, window_bounds = array<i64: 1, 4, 128>}, {transform_indices = @transform_3, window_bounds = array<i64: 1, 4, 128>}, {transform_indices = @transform_4, window_bounds = array<i64: 1, 4, 128>}]} {
    %c0_i32 = arith.constant 0 : i32
    %0 = arith.cmpi eq, %arg1, %c0_i32 : i32
    %1 = arith.extui %0 : i1 to i32
    %c0_i32_0 = arith.constant 0 : i32
    %2 = arith.cmpi ne, %1, %c0_i32_0 : i32
    scf.if %2 {
      %cst_37 = arith.constant 0.000000e+00 : f32
      %79 = vector.broadcast %cst_37 : f32 to vector<4x128xf32>
      %c0_38 = arith.constant 0 : index
      %c0_39 = arith.constant 0 : index
      %c0_40 = arith.constant 0 : index
      %80 = vector.load %arg4[%c0_38, %c0_39, %c0_40] : memref<1x4x128xf32, #tpu.memory_space<vmem>>, vector<1x4x128xf32>
      %81 = vector.shape_cast %80 : vector<1x4x128xf32> to vector<4x128xf32>
      %82 = vector.shape_cast %79 : vector<4x128xf32> to vector<1x4x128xf32>
      tpu.vector_store %arg4[%c0_38, %c0_39, %c0_40], %82 {strides = array<i32>} : memref<1x4x128xf32, #tpu.memory_space<vmem>>, vector<1x4x128xf32>,
      %cst_41 = arith.constant 0.000000e+00 : f32
      %83 = vector.broadcast %cst_41 : f32 to vector<4x128xf32>
      %c0_42 = arith.constant 0 : index
      %c0_43 = arith.constant 0 : index
      %c0_44 = arith.constant 0 : index
      %84 = vector.load %arg5[%c0_42, %c0_43, %c0_44] : memref<1x4x128xf32, #tpu.memory_space<vmem>>, vector<1x4x128xf32>
      %85 = vector.shape_cast %84 : vector<1x4x128xf32> to vector<4x128xf32>
      %86 = vector.shape_cast %83 : vector<4x128xf32> to vector<1x4x128xf32>
      tpu.vector_store %arg5[%c0_42, %c0_43, %c0_44], %86 {strides = array<i32>} : memref<1x4x128xf32, #tpu.memory_space<vmem>>, vector<1x4x128xf32>,
      %cst_45 = arith.constant 0.000000e+00 : f32
      %87 = vector.broadcast %cst_45 : f32 to vector<4x128xf32>
      %c0_46 = arith.constant 0 : index
      %c0_47 = arith.constant 0 : index
      %c0_48 = arith.constant 0 : index
      %88 = vector.load %arg6[%c0_46, %c0_47, %c0_48] : memref<1x4x128xf32, #tpu.memory_space<vmem>>, vector<1x4x128xf32>
      %89 = vector.shape_cast %88 : vector<1x4x128xf32> to vector<4x128xf32>
      %90 = vector.shape_cast %87 : vector<4x128xf32> to vector<1x4x128xf32>
      tpu.vector_store %arg6[%c0_46, %c0_47, %c0_48], %90 {strides = array<i32>} : memref<1x4x128xf32, #tpu.memory_space<vmem>>, vector<1x4x128xf32>,
    } else {
    }
    %3 = tpu.iota {dimensions = array<i32: 0>} : vector<4x128xi32>
    %cst = arith.constant 0.000000e+00 : f32
    %4 = vector.broadcast %cst : f32 to vector<4x128xf32>
    %cst_1 = arith.constant 0.000000e+00 : f32
    %5 = vector.broadcast %cst_1 : f32 to vector<4x128xf32>
    %cst_2 = arith.constant 0.000000e+00 : f32
    %6 = vector.broadcast %cst_2 : f32 to vector<4x128xf32>
    %c0 = arith.constant 0 : index
    %c0_3 = arith.constant 0 : index
    %c0_4 = arith.constant 0 : index
    %7 = vector.load %arg2[%c0, %c0_3, %c0_4] : memref<1x4x256xf32, #tpu.memory_space<vmem>>, vector<1x4x128xf32>
    %8 = vector.shape_cast %7 : vector<1x4x128xf32> to vector<4x128xf32>
    %c0_5 = arith.constant 0 : index
    %c0_6 = arith.constant 0 : index
    %c0_7 = arith.constant 0 : index
    %9 = vector.load %arg3[%c0_5, %c0_6, %c0_7] : memref<1x1x256xi32, #tpu.memory_space<vmem>>, vector<1x1x128xi32>
    %10 = vector.shape_cast %9 : vector<1x1x128xi32> to vector<1x128xi32>
    %cst_8 = arith.constant dense<0xFF800000> : vector<128xf32>
    %11 = vector.multi_reduction <maximumf>, %8, %cst_8 [0] : vector<4x128xf32> to vector<128xf32>
    %12 = vector.shape_cast %11 : vector<128xf32> to vector<1x128xf32>
    %13 = vector.broadcast %12 : vector<1x128xf32> to vector<4x128xf32>
    %14 = arith.subf %8, %13 : vector<4x128xf32>
    %15 = math.exp %14 : vector<4x128xf32>
    %cst_9 = arith.constant dense<0.000000e+00> : vector<128xf32>
    %16 = vector.multi_reduction <add>, %15, %cst_9 [0] : vector<4x128xf32> to vector<128xf32>
    %17 = vector.shape_cast %16 : vector<128xf32> to vector<1x128xf32>
    %18 = tpu.reciprocal %17 {approx = true} : vector<1x128xf32> -> vector<1x128xf32>
    %19 = arith.mulf %17, %18 : vector<1x128xf32>
    %cst_10 = arith.constant 2.000000e+00 : f32
    %20 = vector.broadcast %cst_10 : f32 to vector<1x128xf32>
    %21 = arith.subf %20, %19 : vector<1x128xf32>
    %22 = arith.mulf %18, %21 : vector<1x128xf32>
    %23 = vector.broadcast %22 : vector<1x128xf32> to vector<4x128xf32>
    %24 = arith.mulf %15, %23 : vector<4x128xf32>
    %25 = vector.broadcast %10 : vector<1x128xi32> to vector<4x128xi32>
    %26 = arith.cmpi eq, %25, %3 : vector<4x128xi32>
    %27 = arith.extui %26 : vector<4x128xi1> to vector<4x128xi32>
    %28 = arith.sitofp %27 : vector<4x128xi32> to vector<4x128xf32>
    %29 = arith.mulf %24, %28 : vector<4x128xf32>
    %30 = arith.addf %4, %29 : vector<4x128xf32>
    %31 = arith.mulf %24, %24 : vector<4x128xf32>
    %32 = arith.addf %5, %31 : vector<4x128xf32>
    %33 = arith.addf %6, %28 : vector<4x128xf32>
    %c0_11 = arith.constant 0 : index
    %c0_12 = arith.constant 0 : index
    %c128 = arith.constant 128 : index
    %34 = vector.load %arg2[%c0_11, %c0_12, %c128] : memref<1x4x256xf32, #tpu.memory_space<vmem>>, vector<1x4x128xf32>
    %35 = vector.shape_cast %34 : vector<1x4x128xf32> to vector<4x128xf32>
    %c0_13 = arith.constant 0 : index
    %c0_14 = arith.constant 0 : index
    %c128_15 = arith.constant 128 : index
    %36 = vector.load %arg3[%c0_13, %c0_14, %c128_15] : memref<1x1x256xi32, #tpu.memory_space<vmem>>, vector<1x1x128xi32>
    %37 = vector.shape_cast %36 : vector<1x1x128xi32> to vector<1x128xi32>
    %cst_16 = arith.constant dense<0xFF800000> : vector<128xf32>
    %38 = vector.multi_reduction <maximumf>, %35, %cst_16 [0] : vector<4x128xf32> to vector<128xf32>
    %39 = vector.shape_cast %38 : vector<128xf32> to vector<1x128xf32>
    %40 = vector.broadcast %39 : vector<1x128xf32> to vector<4x128xf32>
    %41 = arith.subf %35, %40 : vector<4x128xf32>
    %42 = math.exp %41 : vector<4x128xf32>
    %cst_17 = arith.constant dense<0.000000e+00> : vector<128xf32>
    %43 = vector.multi_reduction <add>, %42, %cst_17 [0] : vector<4x128xf32> to vector<128xf32>
    %44 = vector.shape_cast %43 : vector<128xf32> to vector<1x128xf32>
    %45 = tpu.reciprocal %44 {approx = true} : vector<1x128xf32> -> vector<1x128xf32>
    %46 = arith.mulf %44, %45 : vector<1x128xf32>
    %cst_18 = arith.constant 2.000000e+00 : f32
    %47 = vector.broadcast %cst_18 : f32 to vector<1x128xf32>
    %48 = arith.subf %47, %46 : vector<1x128xf32>
    %49 = arith.mulf %45, %48 : vector<1x128xf32>
    %50 = vector.broadcast %49 : vector<1x128xf32> to vector<4x128xf32>
    %51 = arith.mulf %42, %50 : vector<4x128xf32>
    %52 = vector.broadcast %37 : vector<1x128xi32> to vector<4x128xi32>
    %53 = arith.cmpi eq, %52, %3 : vector<4x128xi32>
    %54 = arith.extui %53 : vector<4x128xi1> to vector<4x128xi32>
    %55 = arith.sitofp %54 : vector<4x128xi32> to vector<4x128xf32>
    %56 = arith.mulf %51, %55 : vector<4x128xf32>
    %57 = arith.addf %30, %56 : vector<4x128xf32>
    %58 = arith.mulf %51, %51 : vector<4x128xf32>
    %59 = arith.addf %32, %58 : vector<4x128xf32>
    %60 = arith.addf %33, %55 : vector<4x128xf32>
    %c0_19 = arith.constant 0 : index
    %c0_20 = arith.constant 0 : index
    %c0_21 = arith.constant 0 : index
    %61 = vector.load %arg4[%c0_19, %c0_20, %c0_21] : memref<1x4x128xf32, #tpu.memory_space<vmem>>, vector<1x4x128xf32>
    %62 = vector.shape_cast %61 : vector<1x4x128xf32> to vector<4x128xf32>
    %63 = arith.addf %62, %57 : vector<4x128xf32>
    %c0_22 = arith.constant 0 : index
    %c0_23 = arith.constant 0 : index
    %c0_24 = arith.constant 0 : index
    %64 = vector.load %arg4[%c0_22, %c0_23, %c0_24] : memref<1x4x128xf32, #tpu.memory_space<vmem>>, vector<1x4x128xf32>
    %65 = vector.shape_cast %64 : vector<1x4x128xf32> to vector<4x128xf32>
    %66 = vector.shape_cast %63 : vector<4x128xf32> to vector<1x4x128xf32>
    tpu.vector_store %arg4[%c0_22, %c0_23, %c0_24], %66 {strides = array<i32>} : memref<1x4x128xf32, #tpu.memory_space<vmem>>, vector<1x4x128xf32>,
    %c0_25 = arith.constant 0 : index
    %c0_26 = arith.constant 0 : index
    %c0_27 = arith.constant 0 : index
    %67 = vector.load %arg5[%c0_25, %c0_26, %c0_27] : memref<1x4x128xf32, #tpu.memory_space<vmem>>, vector<1x4x128xf32>
    %68 = vector.shape_cast %67 : vector<1x4x128xf32> to vector<4x128xf32>
    %69 = arith.addf %68, %59 : vector<4x128xf32>
    %c0_28 = arith.constant 0 : index
    %c0_29 = arith.constant 0 : index
    %c0_30 = arith.constant 0 : index
    %70 = vector.load %arg5[%c0_28, %c0_29, %c0_30] : memref<1x4x128xf32, #tpu.memory_space<vmem>>, vector<1x4x128xf32>
    %71 = vector.shape_cast %70 : vector<1x4x128xf32> to vector<4x128xf32>
    %72 = vector.shape_cast %69 : vector<4x128xf32> to vector<1x4x128xf32>
    tpu.vector_store %arg5[%c0_28, %c0_29, %c0_30], %72 {strides = array<i32>} : memref<1x4x128xf32, #tpu.memory_space<vmem>>, vector<1x4x128xf32>,
    %c0_31 = arith.constant 0 : index
    %c0_32 = arith.constant 0 : index
    %c0_33 = arith.constant 0 : index
    %73 = vector.load %arg6[%c0_31, %c0_32, %c0_33] : memref<1x4x128xf32, #tpu.memory_space<vmem>>, vector<1x4x128xf32>
    %74 = vector.shape_cast %73 : vector<1x4x128xf32> to vector<4x128xf32>
    %75 = arith.addf %74, %60 : vector<4x128xf32>
    %c0_34 = arith.constant 0 : index
    %c0_35 = arith.constant 0 : index
    %c0_36 = arith.constant 0 : index
    %76 = vector.load %arg6[%c0_34, %c0_35, %c0_36] : memref<1x4x128xf32, #tpu.memory_space<vmem>>, vector<1x4x128xf32>
    %77 = vector.shape_cast %76 : vector<1x4x128xf32> to vector<4x128xf32>
    %78 = vector.shape_cast %75 : vector<4x128xf32> to vector<1x4x128xf32>
    tpu.vector_store %arg6[%c0_34, %c0_35, %c0_36], %78 {strides = array<i32>} : memref<1x4x128xf32, #tpu.memory_space<vmem>>, vector<1x4x128xf32>,
    return
  }
  func.func @transform_0(%arg0: i32, %arg1: i32) -> (i32, i32, i32) {
    %c0_i32 = arith.constant 0 : i32
    %c0_i32_0 = arith.constant 0 : i32
    return %arg0, %c0_i32, %arg1 : i32, i32, i32
  }
  func.func @transform_1(%arg0: i32, %arg1: i32) -> (i32, i32, i32) {
    %c0_i32 = arith.constant 0 : i32
    %c0_i32_0 = arith.constant 0 : i32
    return %arg0, %c0_i32, %arg1 : i32, i32, i32
  }
  func.func @transform_2(%arg0: i32, %arg1: i32) -> (i32, i32, i32) {
    %c0_i32 = arith.constant 0 : i32
    %c0_i32_0 = arith.constant 0 : i32
    %c0_i32_1 = arith.constant 0 : i32
    return %arg0, %c0_i32, %c0_i32_0 : i32, i32, i32
  }
  func.func @transform_3(%arg0: i32, %arg1: i32) -> (i32, i32, i32) {
    %c0_i32 = arith.constant 0 : i32
    %c0_i32_0 = arith.constant 0 : i32
    %c0_i32_1 = arith.constant 0 : i32
    return %arg0, %c0_i32, %c0_i32_0 : i32, i32, i32
  }
  func.func @transform_4(%arg0: i32, %arg1: i32) -> (i32, i32, i32) {
    %c0_i32 = arith.constant 0 : i32
    %c0_i32_0 = arith.constant 0 : i32
    %c0_i32_1 = arith.constant 0 : i32
    return %arg0, %c0_i32, %c0_i32_0 : i32, i32, i32
  }
}

</mosaic_0001>

<bundles_post_ra>
// kernel: tpu_custom_call.1
= control target key start
LH: loop header
LB: loop body
LE: loop exit
PB: predicated region body
PF: predicated region fallthrough
CT: control target
= control target key end

     0   :  { %s1263_s0 = inlined_call_operand.hbm [shape: f32[2,4,256], index: 0, kind: input, shape index: {}]   ;;  %s1264_s1 = inlined_call_operand.hbm [shape: s32[2,1,256], index: 1, kind: input, shape index: {}]   ;;  %s1265_s2 = inlined_call_operand.hbm [shape: f32[2,4,128], index: 2, kind: output, shape index: {0}]   ;;  %s1266_s3 = inlined_call_operand.hbm [shape: f32[2,4,128], index: 3, kind: output, shape index: {1}]   ;;  %s1267_s4 = inlined_call_operand.hbm [shape: f32[2,4,128], index: 4, kind: output, shape index: {2}]  }
   0x1   :  { %1271 = sst [smem:[#allocation15_spill]] %s1263_s0 }
   0x2   :  { %10 = vsyncpa [#allocation3], 0 }
   0x3   :  { %12 = vsyncpa [#allocation3 + $0x1], 0 }
   0x4   :  { %13 = vsyncpa [#allocation6], 0 }
   0x5   :  { %15 = vsyncpa [#allocation6 + $0x1], 0 }
   0x6   :  { %16 = vsyncpa [#allocation4], 0 }
   0x7   :  { %18 = vsyncpa [#allocation4 + $0x1], 0 }
   0x8   :  { %19 = vsyncpa [#allocation9], 0 }
   0x9   :  { %21 = vsyncpa [#allocation9 + $0x1], 0  ;;  %s956_s15 = smov 0   ;;  %s958_s16 = smov 0  }
   0xa   :  { %s960_s17 = smov 0   ;;  %s962_s18 = smov 0  }
   0xb   :  { %s964_s19 = smov 0   ;;  %s966_s20 = smov 0  }
   0xc LB: > { %s987_s21 = sadd.s32 4294967295, %s923_s20   ;;  %s1269_s22 = sadd.s32 4294967294, %s923_s20   ;;  %s923_s20 = sphi %s966_s20, %s27_s20   ;;  %s919_s19 = sphi %s964_s19, %s1291_s19   ;;  %s915_s18 = sphi %s962_s18, %s1290_s18   ;;  %s911_s17 = sphi %s960_s17, %s1289_s17   ;;  %s907_s16 = sphi %s958_s16, %s1288_s16   ;;  %s903_s15 = sphi %s956_s15, %s1287_s15  }
   0xd   : > { %s39_s23 = sadd.s32 1, %s919_s19  ;;  %s48_s24 = sadd.s32 1, %s911_s17 }
   0xe   : > { %p41_p0 = scmp.ge.s32.totalorder %s39_s23, 2  ;;  %p55_p1 = scmp.ne.s32.totalorder %s911_s17, %s907_s16 }
   0xf   : > { %p56_p2 = scmp.eq.s32.totalorder %s923_s20, 0  ;;  %p61_p3 = scmp.ne.s32.totalorder %s907_s16, %s903_s15 }
  0x10   : > { %s1293_s23 = smov (%p41_p0, %s39_s23), 0  ;;  %p62_p5 = scmp.eq.s32.totalorder %s987_s21, 0 }
  0x11   : > { %p999_p4 = por %p56_p2, %p55_p1  ;;  %s43_s26 = ssub.s32 %s919_s19, %s1293_s23 }
  0x12   : > { %p113_p6 = scmp.eq.s32.totalorder %s987_s21, 1  ;;  %p46_p7 = scmp.eq.s32.totalorder %s43_s26, 0 }
  0x13   : > { %p1007_p8 = por %p62_p5, %p61_p3  ;;  %p119_p10 = scmp.eq.s32.totalorder %s1269_s22, 1 }
  0x14   : > { %p1011_p9 = por %p113_p6, %p55_p1  ;;  %p658_p13 = scmp.lt.s32.totalorder %s923_s20, 2 }
  0x15   : > { %s1273_s27 = scalar_select %p1007_p8, 1, 0 }
  0x16   : > { %s1274_s28 = scalar_select %p1011_p9, 1, 0 }
  0x17   : > { %s1018_s29 = scalar_select %p46_p7, %s911_s17, %s48_s24  }
  0x18   : > { %p1020_p11 = por %p119_p10, %p61_p3  ;;  %s1027_s5 = sand.u32 1, %s911_s17  }
  0x19   : > { %s605_s6 = sshll.u32 %s1027_s5, 3  ;;  %s629_s7 = sshll.u32 %s919_s19, 7 }
  0x1a   : > { %s1275_s30 = scalar_select %p1020_p11, 1, 0 }
  0x1b   : > { %s1276_s0 = sld [smem:[#allocation15_spill]]  ;;  %s195_s11 = scalar_lea.vmem [#allocation2], %s605_s6 }
  0x1c   : > { %s205_s12 = sshll.u32 %s195_s11, 4  ;;  %p1040_p0 = pnand %p658_p13, %p999_p4  ;;  %s1036_s12 = int_to_ptr.vmem [resolvable:$true] %s205_s12 }
  0x1d   : > { %s192_s14 = scalar_lea.sflag [#allocation3], %s1027_s5 }
  0x1e   : > { %p719_p5 = pneg %p1040_p0 }
  0x21   : > { %s1034_s10 = scalar_lea.hbm %s1276_s0, %s629_s7  ;;  %s722_s25 = scalar_lea.hbm %s1276_s0, 256 }
  0x22   : > { %s717_s24 = scalar_lea.hbm %s1034_s10, 128  ;;  %p723_p4 = scmp.lt.u32.totalorder %s1034_s10, %s1276_s0 }
  0x23   : > { %p718_p3 = scmp.ne.s32.totalorder %s1034_s10, %s717_s24  ;;  %p724_p10 = scmp.lt.u32.totalorder %s722_s25, %s717_s24 }
  0x24   : > { %p726_p12 = scmp.lt.u32.totalorder %s717_s24, %s1034_s10 }
  0x25   : > { %p720_p6 = pnand %p719_p5, %p718_p3  ;;  %p725_p13 = por %p724_p10, %p723_p4 }
  0x27   : > { %p721_p7 = pneg %p720_p6  ;;  %p727_p1 = por %p726_p12, %p725_p13 }
  0x29   : > { %p728_p2 = pnand %p727_p1, %p721_p7 }
  0x2b   : > { %731 = shalt.err (!%p728_p2)
}
  0x2c   : > { %s732_s9 = scalar_lea.vmem %s1036_s12, 128  ;;  %s925_s11 = smov [#allocation2]  }
  0x2d   : > { %p733_p3 = scmp.ne.s32.totalorder %s1036_s12, %s732_s9  ;;  %s737_s26 = sshll.u32 %s925_s11, 4  ;;  %s738_s26 = int_to_ptr.vmem [resolvable:$false] %s737_s26 }
  0x2e   : > { %s739_s6 = scalar_lea.vmem %s738_s26, 256  ;;  %p740_p9 = scmp.lt.s32.totalorder %s1036_s12, %s738_s26 }
  0x2f   : > { %p735_p6 = pnand %p733_p3, %p719_p5  ;;  %p741_p4 = scmp.lt.s32.totalorder %s739_s6, %s732_s9 }
  0x31   : > { %p736_p11 = pneg %p735_p6  ;;  %p742_p10 = por %p741_p4, %p740_p9 }
  0x33   : > { %p743_p12 = pnand %p742_p10, %p736_p11 }
  0x35   : > { %746 = shalt.err (!%p743_p12)
}
  0x36   : > { %644 = dma.hbm_to_vmem [thread:$0]  (!%p1040_p0), %s1034_s10, 128, %s1036_s12, %s192_s14  }
  0x37   : > { %p1278_p1 = scmp.lt.s32.totalorder %s923_s20, 3  ;;  %p1279_p2 = scmp.ge.s32.totalorder %s923_s20, 1 }
  0x38   : > { %s608_s25 = sshll.u32 %s1027_s5, 1  ;;  %s630_s7 = sshll.u32 %s919_s19, 5 }
  0x39   : > { %p1076_p7 = pnand %p1279_p2, %p1278_p1  ;;  %s1085_s11 = scalar_lea.hbm %s1264_s1, %s630_s7 }
  0x3a   : > { %s216_s26 = scalar_lea.vmem [#allocation5], %s608_s25  ;;  %s213_s10 = scalar_lea.sflag [#allocation6], %s1027_s5 }
  0x3b   : > { %s1280_s24 = scalar_select %p1076_p7, 1, 0 }
  0x3c   : > { %s226_s6 = sshll.u32 %s216_s26, 4  ;;  %s747_s12 = scalar_lea.hbm %s1085_s11, 32  ;;  %s227_s6 = int_to_ptr.vmem [resolvable:$true] %s226_s6 }
  0x3d   : > { %p748_p9 = scmp.ne.s32.totalorder %s1085_s11, %s747_s12  ;;  %s752_s8 = scalar_lea.hbm %s1264_s1, 64 }
  0x3e   : > { %p753_p3 = scmp.lt.u32.totalorder %s1085_s11, %s1264_s1  ;;  %p754_p6 = scmp.lt.u32.totalorder %s752_s8, %s747_s12 }
  0x3f   : > { %p750_p11 = pnand %p748_p9, %p719_p5  ;;  %p756_p10 = scmp.lt.u32.totalorder %s747_s12, %s1085_s11 }
  0x40   : > { %p755_p4 = por %p754_p6, %p753_p3 }
  0x41   : > { %p751_p13 = pneg %p750_p11 }
  0x42   : > { %p757_p12 = por %p756_p10, %p755_p4 }
  0x44   : > { %p758_p1 = pnand %p757_p12, %p751_p13 }
  0x46   : > { %761 = shalt.err (!%p758_p1)
}
  0x47   : > { %s762_s5 = scalar_lea.vmem %s227_s6, 32  ;;  %s926_s25 = smov [#allocation5]  }
  0x48   : > { %p763_p2 = scmp.ne.s32.totalorder %s227_s6, %s762_s5  ;;  %s767_s22 = sshll.u32 %s926_s25, 4  ;;  %s768_s22 = int_to_ptr.vmem [resolvable:$false] %s767_s22 }
  0x49   : > { %s769_s26 = scalar_lea.vmem %s768_s22, 64  ;;  %p770_p8 = scmp.lt.s32.totalorder %s227_s6, %s768_s22 }
  0x4a   : > { %p765_p9 = pnand %p763_p2, %p719_p5  ;;  %p771_p7 = scmp.lt.s32.totalorder %s769_s26, %s762_s5 }
  0x4c   : > { %p766_p11 = pneg %p765_p9  ;;  %p772_p3 = por %p771_p7, %p770_p8 }
  0x4e   : > { %p773_p6 = pnand %p772_p3, %p766_p11 }
  0x50   : > { %776 = shalt.err (!%p773_p6)
}
  0x51   : > { %647 = dma.hbm_to_vmem [thread:$0]  (!%p1040_p0), %s1085_s11, 32, %s227_s6, %s213_s10  }
  0x52   : > { %p1281_p13 = scmp.ne.s32.totalorder %s1280_s24, 0 }
  0x53   : > { %s1110_s12 = sand.u32 (!%p1281_p13), 1, %s907_s16   ;;  %p1282_p5 = scmp.ne.s32.totalorder (!%p1281_p13), %s1273_s27, 0 }
  0x54   : > { %235 = sbr.rel (%p1281_p13) target bundleno = 223 (0xdf), region = 28  ;;  %s612_s14 = sshll.u32 (!%p1281_p13), %s1110_s12, 3 }
  0x55   : > { %s238_s8 = scalar_lea.sflag (!%p1281_p13), [#allocation3], %s1110_s12  ;;  %s241_s7 = scalar_lea.vmem (!%p1281_p13), [#allocation2], %s612_s14 }
  0x5b   : > { %886 = dma.done.wait (%p1282_p5), %s238_s8, 128  }
  0x5c   : > { %888 = vsyncadd (%p1282_p5), %s238_s8, 4294967168  ;;  %s613_s13 = sshll.u32 %s1110_s12, 1  ;;  %s247_s24 = scalar_lea.sflag [#allocation6], %s1110_s12 }
  0x5d   : > { %s250_s11 = scalar_lea.vmem [#allocation5], %s613_s13 }
  0x5e   : > { %890 = dma.done.wait (%p1282_p5), %s247_s24, 32  }
  0x5f   : > { %892 = vsyncadd (%p1282_p5), %s247_s24, 4294967264  ;;  %s614_s6 = sshll.u32 %s1110_s12, 2  ;;  %v299_v0 = vlaneseq  ;;  %v927_v1 = vmov 0.0   ;;  %vm303_vm0 = vcmask 1043456   ;;  %v301_v3 = vld [vmem:[%s241_s7] sm:$0xf] }
  0x60   : > { %s1125_s10 = scalar_lea.vmem [#allocation8], %s614_s6  ;;  %s1128_s9 = scalar_lea.vmem [#allocation7], %s614_s6  ;;  %v338_v4 = vld [vmem:[%s241_s7 + $0x4] sm:$0xf]  ;;  %v617_v5 = vld [vmem:[%s250_s11] ss:$0 sm:$0xff] }
  0x61   : > { %297 = vst [vmem:[%s1125_s10] sm:$0xf] %v927_v1  ;;  %296 = vst [vmem:[%s1128_s9] sm:$0xf] %v927_v1  ;;  %s1131_s5 = scalar_lea.vmem [#allocation10], %s614_s6  ;;  %v300_v2 = vshrl.u32 %v299_v0, 7  ;;  %v304_v6 = vsel %vm303_vm0, %v301_v3, -inf  ;;  %v340_v7 = vsel %vm303_vm0, %v338_v4, -inf }
  0x62   : > { %298 = vst [vmem:[%s1131_s5] sm:$0xf] %v927_v1  ;;  %v619_v8 = vld [vmem:[%s250_s11 + $0x1] ss:$0 sm:$0xff]  ;;  %v305_v9 = vrot.slane %v304_v6, 4  ;;  %v341_v10 = vrot.slane %v340_v7, 4  ;;  %s388_s27 = sand.u32 1, %s987_s21  }
  0x63   : > { %vm330_vm1 = vcmp.eq.s32.totalorder %v617_v5, %v300_v2  ;;  %vm366_vm2 = vcmp.eq.s32.totalorder %v619_v8, %v300_v2  ;;  %s624_s25 = sshll.u32 %s915_s18, 6  ;;  %s420_s22 = sshll.u32 %s1125_s10, 4  ;;  %s1152_s22 = int_to_ptr.vmem [resolvable:$true] %s420_s22 }
  0x64   : > { %v618_v11 = vsel %vm330_vm1, 1.0, %v927_v1  ;;  %v620_v12 = vsel %vm366_vm2, 1.0, %v927_v1  ;;  %v306_v14 = vmax.f32 %v304_v6, %v305_v9  ;;  %v342_v15 = vmax.f32 %v340_v7, %v341_v10  ;;  %s407_s26 = sshll.u32 %s1128_s9, 4  ;;  %s433_s14 = sshll.u32 %s1131_s5, 4  ;;  %s1159_s26 = int_to_ptr.vmem [resolvable:$true] %s407_s26  ;;  %s1161_s14 = int_to_ptr.vmem [resolvable:$true] %s433_s14 }
  0x65   : > { %v373_v16 = vadd.f32 %v620_v12, %v618_v11  ;;  %s1150_s13 = scalar_lea.hbm %s1266_s3, %s624_s25  ;;  %s1157_s24 = scalar_lea.hbm %s1265_s2, %s624_s25 }
  0x66   : > { %v307_v17 = vrot.slane %v306_v14, 2  ;;  %v343_v18 = vrot.slane %v342_v15, 2  ;;  %s1170_s8 = scalar_lea.sflag [#allocation9], %s388_s27  ;;  %s777_s7 = scalar_lea.vmem %s1152_s22, 64 }
  0x67   : > { %p778_p8 = scmp.ne.s32.totalorder %s1152_s22, %s777_s7  ;;  %p1283_p0 = scmp.ne.s32.totalorder %s1274_s28, 0 }
  0x68   : > { %v308_v20 = vmax.f32 %v306_v14, %v307_v17  ;;  %v344_v21 = vmax.f32 %v342_v15, %v343_v18  ;;  %v377_v60 = vld [vmem:[%s1125_s10] sm:$0xf]  ;;  %v374_v61 = vld [vmem:[%s1128_s9] sm:$0xf]  ;;  %s928_s21 = smov [#allocation8]  }
  0x69   : > { %v380_v13 = vld [vmem:[%s1131_s5] sm:$0xf]  ;;  %p779_p7 = pnand %p778_p8, %p1283_p0  ;;  %s781_s18 = sshll.u32 %s928_s21, 4  ;;  %s782_s18 = int_to_ptr.vmem [resolvable:$false] %s781_s18 }
  0x6a   : > { %v381_v19 = vadd.f32 %v380_v13, %v373_v16  ;;  %v309_v22 = vrot.slane %v308_v20, 1  ;;  %v345_v23 = vrot.slane %v344_v21, 1  ;;  %s783_s0 = scalar_lea.vmem %s782_s18, 128  ;;  %p784_p10 = scmp.lt.s32.totalorder %s1152_s22, %s782_s18 }
  0x6b   : > { %p780_p4 = pneg %p779_p7  ;;  %p785_p12 = scmp.lt.s32.totalorder %s783_s0, %s777_s7 }
  0x6c   : > { %382 = vst [vmem:[%s1131_s5] sm:$0xf] %v381_v19  ;;  %v310_v24 = vmax.f32 %v308_v20, %v309_v22  ;;  %v346_v25 = vmax.f32 %v344_v21, %v345_v23  ;;  %s1168_s5 = scalar_lea.hbm %s1267_s4, %s624_s25 }
  0x6d   : > { %p786_p1 = por %p785_p12, %p784_p10 }
  0x6e   : > { %v311_v26 = vsub.f32 %v301_v3, %v310_v24  ;;  %v347_v27 = vsub.f32 %v338_v4, %v346_v25 }
  0x6f   : > { %p787_p2 = pnand %p786_p1, %p780_p4 }
  0x70   : > { %v312_v28 = vmul.f32 1.442695, %v311_v26  ;;  %v348_v29 = vmul.f32 1.442695, %v347_v27 }
  0x72   : > { %709 = vpow2.f32 %v312_v28 }
  0x73   : > { %711 = vpow2.f32 %v348_v29 }
  0x7c   : > { %v710_v30 = vpop.eup %709 }
  0x7d   : > { %v712_v31 = vpop.eup %711  ;;  %v314_v32 = vsel %vm303_vm0, %v710_v30, 0.0 }
  0x7e   : > { %v315_v33 = vrot.slane %v314_v32, 4  ;;  %v350_v34 = vsel %vm303_vm0, %v712_v31, 0.0 }
  0x7f   : > { %v351_v35 = vrot.slane %v350_v34, 4 }
  0x80   : > { %v316_v36 = vadd.f32 %v315_v33, %v314_v32 }
  0x81   : > { %v352_v37 = vadd.f32 %v351_v35, %v350_v34 }
  0x82   : > { %v317_v38 = vrot.slane %v316_v36, 2 }
  0x83   : > { %v353_v39 = vrot.slane %v352_v37, 2 }
  0x84   : > { %v318_v40 = vadd.f32 %v317_v38, %v316_v36 }
  0x85   : > { %v354_v41 = vadd.f32 %v353_v39, %v352_v37 }
  0x86   : > { %v319_v42 = vrot.slane %v318_v40, 1 }
  0x87   : > { %v355_v43 = vrot.slane %v354_v41, 1 }
  0x88   : > { %v320_v44 = vadd.f32 %v319_v42, %v318_v40 }
  0x89   : > { %v356_v45 = vadd.f32 %v355_v43, %v354_v41 }
  0x8a   : > { %713 = vrcp.f32 %v320_v44 }
  0x8b   : > { %715 = vrcp.f32 %v356_v45 }
  0x94   : > { %v714_v46 = vpop.eup %713 }
  0x95   : > { %v716_v47 = vpop.eup %715  ;;  %v322_v48 = vmul.f32 %v714_v46, %v320_v44 }
  0x96   : > { %v358_v49 = vmul.f32 %v716_v47, %v356_v45 }
  0x97   : > { %v323_v50 = vsub.f32 2.0, %v322_v48 }
  0x98   : > { %v359_v51 = vsub.f32 2.0, %v358_v49 }
  0x99   : > { %v324_v52 = vmul.f32 %v714_v46, %v323_v50 }
  0x9a   : > { %v360_v53 = vmul.f32 %v716_v47, %v359_v51 }
  0x9b   : > { %v325_v54 = vmul.f32 %v710_v30, %v324_v52 }
  0x9c   : > { %v361_v55 = vmul.f32 %v712_v31, %v360_v53 }
  0x9d   : > { %v335_v56 = vmul.f32 %v325_v54, %v325_v54  ;;  %v333_v57 = vmul.f32 %v618_v11, %v325_v54 }
  0x9e   : > { %v371_v58 = vmul.f32 %v361_v55, %v361_v55  ;;  %v369_v59 = vmul.f32 %v620_v12, %v361_v55 }
  0xa0   : > { %v372_v62 = vadd.f32 %v371_v58, %v335_v56  ;;  %v370_v63 = vadd.f32 %v369_v59, %v333_v57 }
  0xa2   : > { %v378_v0 = vadd.f32 %v377_v60, %v372_v62  ;;  %v375_v1 = vadd.f32 %v374_v61, %v370_v63 }
  0xa4   : > { %379 = vst [vmem:[%s1125_s10] sm:$0xf] %v378_v0  ;;  %376 = vst [vmem:[%s1128_s9] sm:$0xf] %v375_v1 }
  0xa5   : > { %790 = shalt.err (!%p787_p2)
}
  0xa6   : > { %s791_s10 = scalar_lea.hbm %s1150_s13, 64  ;;  %s795_s25 = scalar_lea.hbm %s1266_s3, 128 }
  0xa7   : > { %p792_p9 = scmp.ne.s32.totalorder %s1150_s13, %s791_s10  ;;  %p796_p6 = scmp.lt.u32.totalorder %s1150_s13, %s1266_s3 }
  0xa8   : > { %p797_p13 = scmp.lt.u32.totalorder %s795_s25, %s791_s10  ;;  %p799_p8 = scmp.lt.u32.totalorder %s791_s10, %s1150_s13 }
  0xa9   : > { %p793_p11 = pnand %p792_p9, %p1283_p0 }
  0xaa   : > { %p798_p5 = por %p797_p13, %p796_p6 }
  0xab   : > { %p794_p3 = pneg %p793_p11 }
  0xac   : > { %p800_p7 = por %p799_p8, %p798_p5 }
  0xae   : > { %p801_p4 = pnand %p800_p7, %p794_p3 }
  0xb0   : > { %804 = shalt.err (!%p801_p4)
}
  0xb1   : > { %636 = dma.vmem_to_hbm [thread:$0]  (%p1283_p0), %s1152_s22, 64, %s1150_s13, %s1170_s8  }
  0xb2   : > { %s384_s0 = scalar_lea.sflag [#allocation4], %s1110_s12  ;;  %s805_s7 = scalar_lea.vmem %s1159_s26, 64 }
  0xb3   : > { %p806_p10 = scmp.ne.s32.totalorder %s1159_s26, %s805_s7  ;;  %s929_s21 = smov [#allocation7]  }
  0xb4   : > { %s809_s18 = sshll.u32 %s929_s21, 4  ;;  %s810_s18 = int_to_ptr.vmem [resolvable:$false] %s809_s18 }
  0xb5   : > { %p807_p12 = pnand %p806_p10, %p1283_p0  ;;  %s811_s10 = scalar_lea.vmem %s810_s18, 128 }
  0xb6   : > { %p812_p2 = scmp.lt.s32.totalorder %s1159_s26, %s810_s18  ;;  %p813_p9 = scmp.lt.s32.totalorder %s811_s10, %s805_s7 }
  0xb7   : > { %p808_p1 = pneg %p807_p12 }
  0xb8   : > { %p814_p11 = por %p813_p9, %p812_p2 }
  0xba   : > { %p815_p3 = pnand %p814_p11, %p808_p1 }
  0xbc   : > { %818 = shalt.err (!%p815_p3)
}
  0xbd   : > { %s819_s12 = scalar_lea.hbm %s1157_s24, 64  ;;  %s823_s9 = scalar_lea.hbm %s1265_s2, 128 }
  0xbe   : > { %p820_p6 = scmp.ne.s32.totalorder %s1157_s24, %s819_s12  ;;  %p824_p8 = scmp.lt.u32.totalorder %s1157_s24, %s1265_s2 }
  0xbf   : > { %p825_p7 = scmp.lt.u32.totalorder %s823_s9, %s819_s12  ;;  %p827_p10 = scmp.lt.u32.totalorder %s819_s12, %s1157_s24 }
  0xc0   : > { %p821_p13 = pnand %p820_p6, %p1283_p0 }
  0xc1   : > { %p826_p4 = por %p825_p7, %p824_p8 }
  0xc2   : > { %p822_p5 = pneg %p821_p13 }
  0xc3   : > { %p828_p12 = por %p827_p10, %p826_p4 }
  0xc5   : > { %p829_p1 = pnand %p828_p12, %p822_p5 }
  0xc7   : > { %832 = shalt.err (!%p829_p1)
}
  0xc8   : > { %635 = dma.vmem_to_hbm [thread:$0]  (%p1283_p0), %s1159_s26, 64, %s1157_s24, %s384_s0  }
  0xc9   : > { %s833_s11 = scalar_lea.vmem %s1161_s14, 64  ;;  %s930_s6 = smov [#allocation10]  }
  0xca   : > { %p834_p2 = scmp.ne.s32.totalorder %s1161_s14, %s833_s11  ;;  %s837_s7 = sshll.u32 %s930_s6, 4  ;;  %s838_s7 = int_to_ptr.vmem [resolvable:$false] %s837_s7 }
  0xcb   : > { %s839_s21 = scalar_lea.vmem %s838_s7, 128  ;;  %p840_p3 = scmp.lt.s32.totalorder %s1161_s14, %s838_s7 }
  0xcc   : > { %p835_p9 = pnand %p834_p2, %p1283_p0  ;;  %p841_p6 = scmp.lt.s32.totalorder %s839_s21, %s833_s11 }
  0xce   : > { %p836_p11 = pneg %p835_p9  ;;  %p842_p13 = por %p841_p6, %p840_p3 }
  0xd0   : > { %p843_p5 = pnand %p842_p13, %p836_p11 }
  0xd2   : > { %846 = shalt.err (!%p843_p5)
}
  0xd3   : > { %s847_s26 = scalar_lea.hbm %s1168_s5, 64  ;;  %s851_s18 = scalar_lea.hbm %s1267_s4, 128 }
  0xd4   : > { %p848_p8 = scmp.ne.s32.totalorder %s1168_s5, %s847_s26  ;;  %p852_p10 = scmp.lt.u32.totalorder %s1168_s5, %s1267_s4 }
  0xd5   : > { %p853_p12 = scmp.lt.u32.totalorder %s851_s18, %s847_s26  ;;  %p855_p2 = scmp.lt.u32.totalorder %s847_s26, %s1168_s5 }
  0xd6   : > { %p849_p7 = pnand %p848_p8, %p1283_p0 }
  0xd7   : > { %p854_p1 = por %p853_p12, %p852_p10 }
  0xd8   : > { %p850_p4 = pneg %p849_p7 }
  0xd9   : > { %p856_p9 = por %p855_p2, %p854_p1 }
  0xdb   : > { %p857_p11 = pnand %p856_p9, %p850_p4 }
  0xdd   : > { %860 = shalt.err (!%p857_p11)
}
  0xde   : > { %637 = dma.vmem_to_hbm [thread:$0]  (%p1283_p0), %s1161_s14, 64, %s1168_s5, %s1170_s8  }
  0xdf PF: > { %s445_s22 = sand.u32 1, %s903_s15   ;;  %p1284_p3 = scmp.ne.s32.totalorder %s1275_s30, 0 }
  0xe0   : > { %p1285_p6 = scmp.ge.s32.totalorder %s923_s20, 2  ;;  %s446_s13 = scalar_lea.sflag [#allocation4], %s445_s22 }
  0xe2   : > { %p649_p13 = pnand %p1285_p6, %p1284_p3 }
  0xe4   : > { %894 = dma.done.wait (!%p649_p13), %s446_s13, 64  }
  0xe5   : > { %896 = vsyncadd (!%p649_p13), %s446_s13, 4294967232  ;;  %s1286_s9 = sadd.s32 4294967294, %s923_s20  }
  0xe6   : > { %s454_s27 = sand.u32 1, %s1286_s9  }
  0xe7   : > { %s455_s25 = scalar_lea.sflag [#allocation9], %s454_s27 }
  0xe8   : > { %898 = dma.done.wait (!%p649_p13), %s455_s25, 128  }
  0xe9   : > { %900 = vsyncadd (!%p649_p13), %s455_s25, 4294967168  ;;  %s27_s20 = sadd.s32 1, %s923_s20   ;;  %s1287_s15 = smov %s907_s16 }
  0xea   : > { %p24_p0 = scmp.ge.s32.totalorder %s27_s20, 4   ;;  %s1288_s16 = smov %s911_s17 }
  0xeb   : > { %s1289_s17 = smov %s1018_s29  ;;  %s1290_s18 = smov %s919_s19 }
  0xec   : > { %s1291_s19 = smov %s1293_s23  ;;  %26 = sbr.rel (!%p24_p0) target bundleno = 12 (0xc), region = 122 }
  0xf3   :  { %469 = vsyncpa [#allocation3], 1 }
  0xf4   :  { %471 = vsyncpa [#allocation3 + $0x1], 1 }
  0xf5   :  { %472 = vsyncpa [#allocation6], 1 }
  0xf6   :  { %474 = vsyncpa [#allocation6 + $0x1], 1 }
  0xf7   :  { %475 = vsyncpa [#allocation4], 1 }
  0xf8   :  { %477 = vsyncpa [#allocation4 + $0x1], 1 }
  0xf9   :  { %478 = vsyncpa [#allocation9], 1 }
  0xfa   :  { %480 = vsyncpa [#allocation9 + $0x1], 1 }

</bundles_post_ra>
